<compile_context>
chip_gen: v6e
topology: v6e:2x2x1
jax: 0.10.0
libtpu: 0.0.40
codegen_flags: <defaults>
</compile_context>

<pallas_src>
import functools

import jax
import jax.numpy as jnp
from jax.experimental import pallas as pl
from jax.experimental.pallas import tpu as pltpu

MARGIN = 1.0
EPS = 1e-9


def _contrastive_kernel(o1_ref, o2_ref, t_ref, partial_ref, *, margin, eps,
                        true_b, tile_b, tiles_per_split):
    c = pl.program_id(0)             # parallel split (megacore on v7x)
    j = pl.program_id(1)             # batch tile within the split
    tile = c * tiles_per_split + j   # global batch-tile index

    @pl.when(j == 0)
    def _init():
        partial_ref[...] = jnp.zeros_like(partial_ref)

    # Cast AFTER the block load: HBM traffic stays in the native (possibly
    # bf16) dtype, and the per-row reduction over D is done in f32.
    o1 = o1_ref[...].astype(jnp.float32)
    o2 = o2_ref[...].astype(jnp.float32)
    t = t_ref[...].astype(jnp.float32)                        # (TB, 1)

    diff = o2 - o1
    distances = jnp.sum(diff * diff, axis=1, keepdims=True)   # (TB, 1)
    hinge = jnp.maximum(margin - jnp.sqrt(distances + eps), 0.0)
    losses = 0.5 * (t * distances + (1.0 - t) * hinge * hinge)

    if true_b % tile_b != 0:
        # Mask rows past the true batch size (partial last tile padding).
        row = (jax.lax.broadcasted_iota(jnp.int32, losses.shape, 0)
               + tile * tile_b)
        losses = jnp.where(row < true_b, losses, jnp.float32(0.0))

    partial_ref[...] += jnp.sum(losses)


def _sublane_granule(itemsize):
    # f32 -> 8, bf16 -> 16, int8/fp8 -> 32 rows per native tile.
    return max(8, 32 // max(1, itemsize))


def _choose_batch_tile(B, D, itemsize):
    # Keep each (TB, D) input block <= ~4 MiB so 2 inputs x 2 pipeline buffers
    # is <= ~16 MiB (fits v5e's 16 MiB scoped default and v7x's 64 MiB VMEM),
    # while staying >= ~512 rows when possible (HBM-bandwidth knee).
    g = _sublane_granule(itemsize)
    budget = 4 * 1024 * 1024
    cap = (budget // max(1, D * itemsize)) // g * g
    cap = max(g, min(int(cap), 2048))
    if B <= cap:
        return B            # single full-batch block (full-dim block is legal)
    return cap              # multiple of the sublane granule


def contrastive_loss(output1, output2, target, margin=MARGIN,
                     size_average=True, block_b=None):
    """Pallas TPU contrastive loss (matches the PyTorch module's forward)."""
    B, D = output1.shape
    itemsize = jnp.dtype(output1.dtype).itemsize

    tb = int(block_b) if block_b is not None else _choose_batch_tile(
        B, D, itemsize)
    tb = min(tb, B)
    num_tiles = pl.cdiv(B, tb)
    # Split tiles across the two TensorCores (v7x) when it divides evenly;
    # otherwise a single "arbitrary" accumulation axis.
    nsplit = 2 if (num_tiles % 2 == 0 and num_tiles >= 2) else 1
    tiles_per_split = num_tiles // nsplit

    t2d = target.reshape(B, 1)   # layout plumbing only; dtype cast is in-kernel
    t_itemsize = jnp.dtype(t2d.dtype).itemsize

    kernel = functools.partial(
        _contrastive_kernel, margin=float(margin), eps=float(EPS),
        true_b=B, tile_b=tb, tiles_per_split=tiles_per_split)

    idx = lambda c, j: (c * tiles_per_split + j, 0)

    block_bytes = tb * D * itemsize
    vmem_limit = int(min(max(8 * block_bytes + (2 << 20), 16 << 20), 48 << 20))

    cost = pl.CostEstimate(
        flops=int(3 * B * D + 8 * B),
        transcendentals=int(B),
        bytes_accessed=int(2 * B * D * itemsize + B * t_itemsize + nsplit * 4))

    partials = pl.pallas_call(
        kernel,
        out_shape=jax.ShapeDtypeStruct((nsplit, 1), jnp.float32),
        grid=(nsplit, tiles_per_split),
        in_specs=[
            pl.BlockSpec((tb, D), idx),
            pl.BlockSpec((tb, D), idx),
            pl.BlockSpec((tb, 1), idx),
        ],
        out_specs=pl.BlockSpec((1, 1), lambda c, j: (c, 0)),
        compiler_params=pltpu.CompilerParams(
            dimension_semantics=("parallel", "arbitrary"),
            vmem_limit_bytes=vmem_limit),
        cost_estimate=cost,
    )(output1, output2, t2d)

    total = jnp.sum(partials)
    return total / B if size_average else total


def _reference(output1, output2, target, margin=MARGIN, size_average=True):
    # Pure-JAX reference mirroring the PyTorch forward.
    o1 = output1.astype(jnp.float32)
    o2 = output2.astype(jnp.float32)
    distances = jnp.sum((o2 - o1) ** 2, axis=1)
    t = target.astype(jnp.float32)
    hinge = jnp.maximum(margin - jnp.sqrt(distances + EPS), 0.0)
    losses = 0.5 * (t * distances + (1.0 - t) * hinge ** 2)
    return jnp.mean(losses) if size_average else jnp.sum(losses)


if __name__ == "__main__":
    key = jax.random.PRNGKey(0)
    k1, k2, k3 = jax.random.split(key, 3)

    # Small demo shapes consistent with the module: batch=8, hidden=32.
    B, D = 8, 32
    output1 = jax.random.normal(k1, (B, D), dtype=jnp.float32)
    output2 = jax.random.normal(k2, (B, D), dtype=jnp.float32)
    target = jax.random.bernoulli(k3, 0.5, (B,)).astype(jnp.int32)

    loss = jax.block_until_ready(
        contrastive_loss(output1, output2, target, margin=MARGIN,
                         size_average=True))
    ref = _reference(output1, output2, target, margin=MARGIN,
                     size_average=True)
    assert jnp.allclose(loss, ref, atol=1e-5, rtol=1e-5), (loss, ref)

    # Exercise the tiled accumulation path with a partial (masked) last tile
    # and sum reduction.
    B2, D2 = 20, 32
    a1 = jax.random.normal(k1, (B2, D2), dtype=jnp.float32)
    a2 = jax.random.normal(k2, (B2, D2), dtype=jnp.float32)
    tgt2 = jax.random.bernoulli(k3, 0.5, (B2,)).astype(jnp.int32)
    loss2 = jax.block_until_ready(
        contrastive_loss(a1, a2, tgt2, margin=MARGIN, size_average=False,
                         block_b=8))
    ref2 = _reference(a1, a2, tgt2, margin=MARGIN, size_average=False)
    assert jnp.allclose(loss2, ref2, atol=1e-4, rtol=1e-5), (loss2, ref2)

    # Exercise the 2-way parallel split and bf16 inputs (in-kernel f32 cast).
    B3, D3 = 64, 32
    b1 = jax.random.normal(k1, (B3, D3), dtype=jnp.float32).astype(jnp.bfloat16)
    b2 = jax.random.normal(k2, (B3, D3), dtype=jnp.float32).astype(jnp.bfloat16)
    tgt3 = jax.random.bernoulli(k3, 0.5, (B3,)).astype(jnp.int32)
    loss3 = jax.block_until_ready(
        contrastive_loss(b1, b2, tgt3, margin=MARGIN, size_average=True,
                         block_b=16))
    ref3 = _reference(b1, b2, tgt3, margin=MARGIN, size_average=True)
    assert jnp.allclose(loss3, ref3, atol=1e-4, rtol=1e-4), (loss3, ref3)

    print("KERNEL_OK")
</pallas_src>

<mosaic_0001>
module attributes {stable_mosaic.version = 11 : i64} {
  func.func @_contrastive_kernel(%arg0: i32, %arg1: i32, %arg2: memref<8x32xf32, #tpu.memory_space<vmem>>, %arg3: memref<8x32xf32, #tpu.memory_space<vmem>>, %arg4: memref<8x1xi32, #tpu.memory_space<vmem>>, %arg5: memref<1x1xf32, #tpu.memory_space<vmem>>) attributes {dimension_semantics = [#tpu.dimension_semantics<parallel>, #tpu.dimension_semantics<arbitrary>], iteration_bounds = array<i64: 1, 1>, scalar_prefetch = 0 : i64, scratch_operands = 0 : i64, tpu.core_type = #tpu.core_type<tc>, window_params = [{transform_indices = @transform_0, window_bounds = array<i64: 8, 32>}, {transform_indices = @transform_1, window_bounds = array<i64: 8, 32>}, {transform_indices = @transform_2, window_bounds = array<i64: 8, 1>}, {transform_indices = @transform_3, window_bounds = array<i64: 1, 1>}]} {
    %c0_i32 = arith.constant 0 : i32
    %0 = arith.cmpi eq, %arg1, %c0_i32 : i32
    %1 = arith.extui %0 : i1 to i32
    %c0_i32_0 = arith.constant 0 : i32
    %2 = arith.cmpi ne, %1, %c0_i32_0 : i32
    scf.if %2 {
      %cst_16 = arith.constant 0.000000e+00 : f32
      %34 = vector.broadcast %cst_16 : f32 to vector<1x1xf32>
      %c0_17 = arith.constant 0 : index
      %c0_18 = arith.constant 0 : index
      %35 = vector.load %arg5[%c0_17, %c0_18] : memref<1x1xf32, #tpu.memory_space<vmem>>, vector<1x1xf32>
      tpu.vector_store %arg5[%c0_17, %c0_18], %34 {strides = array<i32>} : memref<1x1xf32, #tpu.memory_space<vmem>>, vector<1x1xf32>,
    } else {
    }
    %c0 = arith.constant 0 : index
    %c0_1 = arith.constant 0 : index
    %3 = vector.load %arg2[%c0, %c0_1] : memref<8x32xf32, #tpu.memory_space<vmem>>, vector<8x32xf32>
    %c0_2 = arith.constant 0 : index
    %c0_3 = arith.constant 0 : index
    %4 = vector.load %arg3[%c0_2, %c0_3] : memref<8x32xf32, #tpu.memory_space<vmem>>, vector<8x32xf32>
    %c0_4 = arith.constant 0 : index
    %c0_5 = arith.constant 0 : index
    %5 = vector.load %arg4[%c0_4, %c0_5] : memref<8x1xi32, #tpu.memory_space<vmem>>, vector<8x1xi32>
    %6 = arith.sitofp %5 : vector<8x1xi32> to vector<8x1xf32>
    %7 = arith.subf %4, %3 : vector<8x32xf32>
    %8 = arith.mulf %7, %7 : vector<8x32xf32>
    %cst = arith.constant dense<0.000000e+00> : vector<8xf32>
    %9 = vector.multi_reduction <add>, %8, %cst [1] : vector<8x32xf32> to vector<8xf32>
    %10 = vector.shape_cast %9 : vector<8xf32> to vector<8x1xf32>
    %cst_6 = arith.constant 9.99999971E-10 : f32
    %11 = vector.broadcast %cst_6 : f32 to vector<8x1xf32>
    %12 = arith.addf %10, %11 : vector<8x1xf32>
    %13 = math.sqrt %12 : vector<8x1xf32>
    %cst_7 = arith.constant 1.000000e+00 : f32
    %14 = vector.broadcast %cst_7 : f32 to vector<8x1xf32>
    %15 = arith.subf %14, %13 : vector<8x1xf32>
    %cst_8 = arith.constant 0.000000e+00 : f32
    %16 = vector.broadcast %cst_8 : f32 to vector<8x1xf32>
    %17 = arith.maximumf %15, %16 : vector<8x1xf32>
    %18 = arith.mulf %6, %10 : vector<8x1xf32>
    %cst_9 = arith.constant 1.000000e+00 : f32
    %19 = vector.broadcast %cst_9 : f32 to vector<8x1xf32>
    %20 = arith.subf %19, %6 : vector<8x1xf32>
    %21 = arith.mulf %20, %17 : vector<8x1xf32>
    %22 = arith.mulf %21, %17 : vector<8x1xf32>
    %23 = arith.addf %18, %22 : vector<8x1xf32>
    %cst_10 = arith.constant 5.000000e-01 : f32
    %24 = vector.broadcast %cst_10 : f32 to vector<8x1xf32>
    %25 = arith.mulf %24, %23 : vector<8x1xf32>
    %c0_11 = arith.constant 0 : index
    %c0_12 = arith.constant 0 : index
    %26 = vector.load %arg5[%c0_11, %c0_12] : memref<1x1xf32, #tpu.memory_space<vmem>>, vector<1x1xf32>
    %27 = vector.shape_cast %25 : vector<8x1xf32> to vector<1x8x1xf32>
    %cst_13 = arith.constant dense<0.000000e+00> : vector<1xf32>
    %28 = vector.multi_reduction <add>, %27, %cst_13 [1, 2] : vector<1x8x1xf32> to vector<1xf32>
    %29 = vector.shape_cast %28 : vector<1xf32> to vector<1x1x1xf32>
    %30 = vector.extract %29[0, 0, 0] : f32 from vector<1x1x1xf32>
    %31 = vector.broadcast %30 : f32 to vector<1x1xf32>
    %32 = arith.addf %26, %31 : vector<1x1xf32>
    %c0_14 = arith.constant 0 : index
    %c0_15 = arith.constant 0 : index
    %33 = vector.load %arg5[%c0_14, %c0_15] : memref<1x1xf32, #tpu.memory_space<vmem>>, vector<1x1xf32>
    tpu.vector_store %arg5[%c0_14, %c0_15], %32 {strides = array<i32>} : memref<1x1xf32, #tpu.memory_space<vmem>>, vector<1x1xf32>,
    return
  }
  func.func @transform_0(%arg0: i32, %arg1: i32) -> (i32, i32) {
    %c1_i32 = arith.constant 1 : i32
    %0 = arith.muli %arg0, %c1_i32 : i32
    %1 = arith.addi %0, %arg1 : i32
    %c0_i32 = arith.constant 0 : i32
    %c0_i32_0 = arith.constant 0 : i32
    return %1, %c0_i32 : i32, i32
  }
  func.func @transform_1(%arg0: i32, %arg1: i32) -> (i32, i32) {
    %c1_i32 = arith.constant 1 : i32
    %0 = arith.muli %arg0, %c1_i32 : i32
    %1 = arith.addi %0, %arg1 : i32
    %c0_i32 = arith.constant 0 : i32
    %c0_i32_0 = arith.constant 0 : i32
    return %1, %c0_i32 : i32, i32
  }
  func.func @transform_2(%arg0: i32, %arg1: i32) -> (i32, i32) {
    %c1_i32 = arith.constant 1 : i32
    %0 = arith.muli %arg0, %c1_i32 : i32
    %1 = arith.addi %0, %arg1 : i32
    %c0_i32 = arith.constant 0 : i32
    %c0_i32_0 = arith.constant 0 : i32
    return %1, %c0_i32 : i32, i32
  }
  func.func @transform_3(%arg0: i32, %arg1: i32) -> (i32, i32) {
    %c0_i32 = arith.constant 0 : i32
    %c0_i32_0 = arith.constant 0 : i32
    return %arg0, %c0_i32 : i32, i32
  }
}

</mosaic_0001>

<bundles_post_ra>
// kernel: tpu_custom_call.1
= control target key start
LH: loop header
LB: loop body
LE: loop exit
PB: predicated region body
PF: predicated region fallthrough
CT: control target
= control target key end

     0   :  { %8 = vsyncpa [#allocation3], 0  ;;  %s228_s0 = inlined_call_operand.vmem [shape: f32[8,32], index: 0, kind: input, shape index: {}]   ;;  %s229_s1 = inlined_call_operand.hbm [shape: f32[8,32], index: 1, kind: input, shape index: {}]   ;;  %s230_s2 = inlined_call_operand.vmem [shape: s32[8,1], index: 2, kind: input, shape index: {}]   ;;  %s231_s3 = inlined_call_operand.hbm [shape: f32[1,1], index: 3, kind: output, shape index: {}]  }
   0x1   :  { %9 = vsyncpa [#allocation4], 0  ;;  %s191_s12 = smov [#allocation2]  }
   0x2   :  { %s27_s13 = sshll.u32 %s191_s12, 4  ;;  %s28_s13 = int_to_ptr.vmem [resolvable:$true] %s27_s13 }
   0x3   :  { %s155_s14 = scalar_lea.vmem %s28_s13, 128  ;;  %p160_p1 = scmp.lt.s32.totalorder %s28_s13, %s28_s13 }
   0x4   :  { %p156_p0 = scmp.ne.s32.totalorder %s28_s13, %s155_s14  ;;  %p161_p2 = scmp.lt.s32.totalorder %s155_s14, %s155_s14 }
   0x6   :  { %p162_p3 = por %p161_p2, %p160_p1 }
   0x8   :  { %p163_p4 = pnand %p162_p3, %p156_p0 }
   0xa   :  { %166 = shalt.err (!%p163_p4)
}
   0xb   :  { %30 = dma.hbm_to_vmem [thread:$0]  %s229_s1, 128, %s28_s13, [#allocation3]  }
   0xc   :  { %187 = dma.done.wait [#allocation3], 128  }
   0xd   :  { %188 = vsyncadd [#allocation3], 4294967168  ;;  %vm69_vm0 = vcmask 0   ;;  %v192_v0 = vmov 0.0   ;;  %v71_v1 = vld [vmem:[%s228_s0] sm:$0xff]  ;;  %vm77_vm1 = vcmask 261120  }
   0xe   :  { %70 = vst.msk [vmem:[#allocation5] sm:$0x1] %vm69_vm0, %v192_v0  ;;  %v72_v2 = vld [vmem:[#allocation2] sm:$0xff]  ;;  %vm98_vm4 = vcmask 7168   ;;  %s193_s0 = smov [#allocation5]  }
   0xf   :  { %v75_v3 = vsub.f32 %v72_v2, %v71_v1  ;;  %v73_v9 = vld [vmem:[%s230_s2] sm:$0xff]  ;;  %s119_s2 = sshll.u32 %s193_s0, 4  ;;  %s120_s2 = int_to_ptr.vmem [resolvable:$true] %s119_s2 }
  0x10   :  { %v74_v12 = vcvt.s32.f32 %v73_v9  ;;  %s167_s21 = scalar_lea.vmem %s120_s2, 16  ;;  %s171_s22 = scalar_lea.vmem %s120_s2, 32 }
  0x11   :  { %v76_v4 = vmul.f32 %v75_v3, %v75_v3  ;;  %p168_p5 = scmp.ne.s32.totalorder %s120_s2, %s167_s21  ;;  %p172_p6 = scmp.lt.s32.totalorder %s120_s2, %s120_s2 }
  0x12   :  { %v92_v15 = vsub.f32 1.0, %v74_v12  ;;  %p173_p7 = scmp.lt.s32.totalorder %s171_s22, %s167_s21 }
  0x13   :  { %v78_v5 = vsel %vm77_vm1, %v76_v4, 0.0 }
  0x14   :  { %79 = vadd.xlane.f32.xlu0 %v78_v5  ;;  %p174_p8 = por %p173_p7, %p172_p6 }
  0x15   :  { %v97_v31 = vld [vmem:[#allocation5] sm:$0x1] }
  0x16   :  { %p175_p9 = pnand %p174_p8, %p168_p5 }
  0x9d   :  { %v80_v6 = vpop.xlane.xlu0 %79 }
  0x9e   :  { %v81_v7 = vadd.f32 1e-09, %v80_v6  ;;  %v91_v19 = vmul.f32 %v80_v6, %v74_v12 }
  0xa0   :  { %145 = vrsqrt.f32 %v81_v7  ;;  %vm84_vm2 = vcmp.eq.f32.partialorder %v81_v7, inf  ;;  %v87_v11 = vand.u32 2147483648, %v81_v7  ;;  %vm86_vm3 = vcmp.eq.f32.partialorder %v81_v7, 0.0 }
  0xad   :  { %v146_v8 = vpop.eup %145 }
  0xae   :  { %v83_v10 = vmul.f32 %v146_v8, %v81_v7 }
  0xb0   :  { %v85_v13 = vsel %vm84_vm2, %v81_v7, %v83_v10 }
  0xb1   :  { %v88_v14 = vsel %vm86_vm3, %v87_v11, %v85_v13 }
  0xb2   :  { %v89_v16 = vsub.f32 1.0, %v88_v14 }
  0xb4   :  { %v90_v17 = vmax.f32 %v89_v16, 0.0 }
  0xb6   :  { %v93_v18 = vmul.f32 %v92_v15, %v90_v17 }
  0xb8   :  { %v94_v20 = vmul.f32 %v93_v18, %v90_v17 }
  0xba   :  { %v95_v21 = vadd.f32 %v94_v20, %v91_v19 }
  0xbc   :  { %v96_v22 = vmul.f32 0.5, %v95_v21 }
  0xbe   :  { %v99_v23 = vsel %vm98_vm4, %v96_v22, 0.0 }
  0xbf   :  { %100 = vadd.xlane.f32.xlu0 %v99_v23 }
 0x148   :  { %v101_v24 = vpop.xlane.xlu0 %100 }
 0x149   :  { %v102_v25 = vrot.slane %v101_v24, 4 }
 0x14b   :  { %v103_v26 = vadd.f32 %v102_v25, %v101_v24 }
 0x14d   :  { %v104_v27 = vrot.slane %v103_v26, 2 }
 0x14f   :  { %v105_v28 = vadd.f32 %v104_v27, %v103_v26 }
 0x151   :  { %v106_v29 = vrot.slane %v105_v28, 1 }
 0x153   :  { %v107_v30 = vadd.f32 %v106_v29, %v105_v28 }
 0x155   :  { %140 = vpush %v107_v30 }
 0x186   :  { %s141_s20 = spop %140 }
 0x187   :  { %v109_v32 = vstv %s141_s20 }
 0x188   :  { %v110_v33 = vadd.f32 %v109_v32, %v97_v31 }
 0x18a   :  { %112 = vst.msk [vmem:[#allocation5] sm:$0x1] %vm69_vm0, %v110_v33 }
 0x18b   :  { %178 = shalt.err (!%p175_p9)
}
 0x18c   :  { %122 = dma.vmem_to_hbm [thread:$0]  %s120_s2, 16, %s231_s3, [#allocation4]  }
 0x18d   :  { %189 = dma.done.wait [#allocation4], 16  }
 0x18e   :  { %190 = vsyncadd [#allocation4], 4294967280 }
 0x18f   :  { %126 = vsyncpa [#allocation3], 1 }
 0x190   :  { %127 = vsyncpa [#allocation4], 1 }

</bundles_post_ra>
